<compile_context>
chip_gen: v7x
topology: tpu7x:2x2x1
jax: 0.10.0
libtpu: 0.0.40
codegen_flags: <defaults>
</compile_context>

<pallas_src>
import functools
import math

import jax
import jax.numpy as jnp
from jax.experimental import pallas as pl
from jax.experimental.pallas import tpu as pltpu

_INV_SQRT2 = 1.0 / math.sqrt(2.0)


def _gelu_exact_f32(h):
    # Exact GELU (erf) — matches torch.nn.GELU(approximate='none').
    return 0.5 * h * (1.0 + jax.lax.erf(h * jnp.float32(_INV_SQRT2)))


def _cast_for_mxu(a, mxu_dtype):
    return a if mxu_dtype is None else a.astype(mxu_dtype)


def _ffn_resident_kernel(x_ref, w1_ref, b1_ref, w2_ref, b2_ref, o_ref, *,
                         mxu_dtype):
    """Weights fully resident in VMEM; one grid step = one token tile."""
    x = _cast_for_mxu(x_ref[...], mxu_dtype)
    w1 = _cast_for_mxu(w1_ref[...], mxu_dtype)
    h = jnp.dot(x, w1, preferred_element_type=jnp.float32)
    h = h + b1_ref[...].astype(jnp.float32)
    h = _gelu_exact_f32(h)
    w2 = _cast_for_mxu(w2_ref[...], mxu_dtype)
    out = jnp.dot(h.astype(w2.dtype), w2, preferred_element_type=jnp.float32)
    out = out + b2_ref[...].astype(jnp.float32)
    # TODO(synk): dropout1/dropout2 are identity (inference); training-mode
    # dropout would use pltpu.prng_seed + pltpu.prng_random_bits.
    o_ref[...] = out.astype(o_ref.dtype)


def _ffn_tiled_kernel(x_ref, w1_ref, b1_ref, w2_ref, b2_ref, o_ref, *scratch,
                      mxu_dtype):
    """Hidden dim tiled as reduction grid axis 1.  If no scratch is passed the
    (f32) output block itself is the accumulator."""
    acc_ref = scratch[0] if scratch else o_ref
    k = pl.program_id(1)

    @pl.when(k == 0)
    def _():
        acc_ref[...] = jnp.zeros_like(acc_ref)

    x = _cast_for_mxu(x_ref[...], mxu_dtype)
    w1 = _cast_for_mxu(w1_ref[...], mxu_dtype)
    h = jnp.dot(x, w1, preferred_element_type=jnp.float32)
    h = h + b1_ref[...].astype(jnp.float32)
    h = _gelu_exact_f32(h)
    w2 = _cast_for_mxu(w2_ref[...], mxu_dtype)
    acc_ref[...] += jnp.dot(h.astype(w2.dtype), w2,
                            preferred_element_type=jnp.float32)

    @pl.when(k == pl.num_programs(1) - 1)
    def _():
        o_ref[...] = (acc_ref[...] + b2_ref[...].astype(jnp.float32)
                      ).astype(o_ref.dtype)


def _vmem_budget_bytes():
    """~85% of physical VMEM; safe 48 MiB fallback (fits v7x's 64 MiB/TC)."""
    try:
        info = pltpu.get_tpu_info()
        cap = getattr(info, "vmem_capacity_bytes", None)
        if cap:
            return int(cap * 0.85)
    except Exception:
        pass
    return 48 * 1024 * 1024


def _pick_hidden_tile(H, th_cap):
    """Largest 128-multiple divisor of H that is <= th_cap (lane-legal block)."""
    if H % 128 == 0:
        best = 128
        d = 128
        while d <= min(th_cap, H):
            if H % d == 0:
                best = d
            d += 128
        return best
    return H  # rare for Conformer dims; full-extent block is always legal.


@functools.partial(jax.jit,
                   static_argnames=("tm", "th", "mxu_dtype",
                                    "force_hidden_tiling"))
def feed_forward_block(x, w1, b1, w2, b2, *, tm=512, th=1024, mxu_dtype=None,
                       force_hidden_tiling=False):
    """x: (..., E).  w1: (E, H), b1: (H,), w2: (H, E), b2: (E,).

    Weights are stored transposed vs. torch.nn.Linear (in_features, out_features).
    mxu_dtype=jnp.bfloat16 feeds the MXU bf16 operands (f32 accumulation).
    """
    orig_shape = x.shape
    E = orig_shape[-1]
    H = w1.shape[1]

    x2d = x.reshape(-1, E)
    M = x2d.shape[0]
    out_dtype = x.dtype

    vmem_budget = _vmem_budget_bytes()

    x_bytes = x2d.dtype.itemsize
    out_bytes = jnp.dtype(out_dtype).itemsize
    weight_bytes = E * H * w1.dtype.itemsize + H * E * w2.dtype.itemsize
    mxu_bytes = (jnp.dtype(mxu_dtype).itemsize if mxu_dtype is not None
                 else w2.dtype.itemsize)

    # Token tile: multiple of 128 (sublane/MXU friendly); for small M use one
    # full-extent tile (no padding, lane/sublane rule satisfied by full dims).
    tm = max(128, (tm // 128) * 128)

    def resident_vmem_est(tmv):
        # Conservative: x/out double-buffered, weights counted twice, hidden
        # intermediate kept in f32 plus one cast copy, biases negligible.
        return (2 * tmv * E * x_bytes
                + 2 * tmv * E * out_bytes
                + 2 * weight_bytes
                + tmv * H * 4 + tmv * H * mxu_bytes
                + 4 * (H + E))

    use_resident = not force_hidden_tiling
    if use_resident:
        cand = tm
        while cand > 128 and resident_vmem_est(min(cand, M)) > vmem_budget:
            cand //= 2
        tm_eff = min(cand, M)
        if resident_vmem_est(tm_eff) > vmem_budget:
            use_resident = False
    if not use_resident:
        tm_eff = min(tm, M)

    m_tiles = pl.cdiv(M, tm_eff)
    b1_2d = b1.reshape(1, H)
    b2_2d = b2.reshape(1, E)

    if use_resident:
        # ---- Primary path: weights resident, grid over tokens only. ----
        cost = pl.CostEstimate(
            flops=4 * M * E * H,                      # two matmuls
            transcendentals=M * H,                    # erf in GELU
            bytes_accessed=(M * E * x_bytes           # x
                            + weight_bytes            # W1 + W2 read once
                            + (H + E) * b1.dtype.itemsize
                            + M * E * out_bytes),     # out
        )
        out = pl.pallas_call(
            functools.partial(_ffn_resident_kernel, mxu_dtype=mxu_dtype),
            out_shape=jax.ShapeDtypeStruct((M, E), out_dtype),
            grid_spec=pltpu.PrefetchScalarGridSpec(
                num_scalar_prefetch=0,
                grid=(m_tiles,),
                in_specs=[
                    pl.BlockSpec((tm_eff, E), lambda i: (i, 0)),  # x tile
                    pl.BlockSpec((E, H), lambda i: (0, 0)),       # W1 (resident)
                    pl.BlockSpec((1, H), lambda i: (0, 0)),       # b1
                    pl.BlockSpec((H, E), lambda i: (0, 0)),       # W2 (resident)
                    pl.BlockSpec((1, E), lambda i: (0, 0)),       # b2
                ],
                out_specs=pl.BlockSpec((tm_eff, E), lambda i: (i, 0)),
            ),
            compiler_params=pltpu.CompilerParams(
                dimension_semantics=("parallel",),
                vmem_limit_bytes=vmem_budget,
            ),
            cost_estimate=cost,
        )(x2d, w1, b1_2d, w2, b2_2d)
    else:
        # ---- Fallback: hidden dim tiled as a reduction grid axis. ----
        th_eff = _pick_hidden_tile(H, th)
        h_tiles = H // th_eff
        use_scratch = (jnp.dtype(out_dtype) != jnp.dtype(jnp.float32))
        scratch = [pltpu.VMEM((tm_eff, E), jnp.float32)] if use_scratch else []
        cost = pl.CostEstimate(
            flops=4 * M * E * H,
            transcendentals=M * H,
            bytes_accessed=(M * E * x_bytes
                            + m_tiles * weight_bytes   # weights re-streamed
                            + (H + E) * b1.dtype.itemsize
                            + M * E * out_bytes),
        )
        out = pl.pallas_call(
            functools.partial(_ffn_tiled_kernel, mxu_dtype=mxu_dtype),
            out_shape=jax.ShapeDtypeStruct((M, E), out_dtype),
            grid_spec=pltpu.PrefetchScalarGridSpec(
                num_scalar_prefetch=0,
                grid=(m_tiles, h_tiles),
                in_specs=[
                    pl.BlockSpec((tm_eff, E), lambda i, k: (i, 0)),  # x tile
                    pl.BlockSpec((E, th_eff), lambda i, k: (0, k)),  # W1 slice
                    pl.BlockSpec((1, th_eff), lambda i, k: (0, k)),  # b1 slice
                    pl.BlockSpec((th_eff, E), lambda i, k: (k, 0)),  # W2 slice
                    pl.BlockSpec((1, E), lambda i, k: (0, 0)),       # b2
                ],
                out_specs=pl.BlockSpec((tm_eff, E), lambda i, k: (i, 0)),
                scratch_shapes=scratch,
            ),
            compiler_params=pltpu.CompilerParams(
                dimension_semantics=("parallel", "arbitrary"),
                vmem_limit_bytes=vmem_budget,
            ),
            cost_estimate=cost,
        )(x2d, w1, b1_2d, w2, b2_2d)

    return out.reshape(orig_shape)


def init_params(key, emb_size, expansion, dtype=jnp.float32):
    """Deterministic init mimicking torch.nn.Linear (uniform +/- 1/sqrt(fan_in))."""
    hidden = expansion * emb_size
    k1, k2, k3, k4 = jax.random.split(key, 4)
    bound1 = 1.0 / (emb_size ** 0.5)
    bound2 = 1.0 / (hidden ** 0.5)
    # Store weights transposed relative to torch (in_features, out_features).
    w1 = jax.random.uniform(k1, (emb_size, hidden), dtype, -bound1, bound1)
    b1 = jax.random.uniform(k2, (hidden,), dtype, -bound1, bound1)
    w2 = jax.random.uniform(k3, (hidden, emb_size), dtype, -bound2, bound2)
    b2 = jax.random.uniform(k4, (emb_size,), dtype, -bound2, bound2)
    return w1, b1, w2, b2


def _reference(x, w1, b1, w2, b2):
    E = x.shape[-1]
    h = jax.nn.gelu(x.reshape(-1, E) @ w1 + b1, approximate=False)
    return (h @ w2 + b2).reshape(x.shape)


if __name__ == "__main__":
    # Small shapes consistent with the module: (batch, seq, emb_size).
    batch, seq, emb_size, expansion, drop_p = 2, 8, 32, 4, 0.1

    key = jax.random.PRNGKey(0)
    kx, kp = jax.random.split(key)
    x = jax.random.normal(kx, (batch, seq, emb_size), jnp.float32)
    w1, b1, w2, b2 = init_params(kp, emb_size, expansion)
    y_ref = _reference(x, w1, b1, w2, b2)

    # 1) Default path: weights resident in VMEM, exact f32 MXU feed.
    y = jax.block_until_ready(feed_forward_block(x, w1, b1, w2, b2))
    assert y.shape == x.shape
    assert jnp.allclose(y, y_ref, atol=1e-5, rtol=1e-5), "resident path mismatch"

    # 2) bf16 MXU operands (throughput path) — looser tolerance vs f32 reference.
    y_bf16 = jax.block_until_ready(
        feed_forward_block(x, w1, b1, w2, b2, mxu_dtype=jnp.bfloat16))
    assert jnp.allclose(y_bf16, y_ref, atol=5e-2, rtol=5e-2), "bf16 path mismatch"

    # 3) Hidden-tiled fallback path (used when weights overflow the VMEM budget).
    y_tiled = jax.block_until_ready(
        feed_forward_block(x, w1, b1, w2, b2, force_hidden_tiling=True))
    assert jnp.allclose(y_tiled, y_ref, atol=1e-5, rtol=1e-5), "tiled path mismatch"

    # 4) Slightly larger config so the fallback actually iterates hidden tiles.
    emb2, exp2 = 64, 4
    kx2, kp2 = jax.random.split(jax.random.PRNGKey(0))
    x2 = jax.random.normal(kx2, (batch, seq, emb2), jnp.float32)
    p2 = init_params(kp2, emb2, exp2)
    y2 = jax.block_until_ready(
        feed_forward_block(x2, *p2, th=128, force_hidden_tiling=True))
    assert jnp.allclose(y2, _reference(x2, *p2), atol=1e-5, rtol=1e-5), \
        "multi-hidden-tile path mismatch"

    print("KERNEL_OK")
</pallas_src>

<mosaic_0001>
module attributes {stable_mosaic.version = 11 : i64} {
  func.func @_ffn_resident_kernel(%arg0: i32, %arg1: memref<16x32xf32, #tpu.memory_space<vmem>>, %arg2: memref<32x128xf32, #tpu.memory_space<vmem>>, %arg3: memref<1x128xf32, #tpu.memory_space<vmem>>, %arg4: memref<128x32xf32, #tpu.memory_space<vmem>>, %arg5: memref<1x32xf32, #tpu.memory_space<vmem>>, %arg6: memref<16x32xf32, #tpu.memory_space<vmem>>) attributes {dimension_semantics = [#tpu.dimension_semantics<parallel>], iteration_bounds = array<i64: 1>, scalar_prefetch = 0 : i64, scratch_operands = 0 : i64, tpu.core_type = #tpu.core_type<tc>, window_params = [{transform_indices = @transform_0, window_bounds = array<i64: 16, 32>}, {pipeline_mode = #tpu.pipeline_mode<synchronous>, transform_indices = @transform_1, window_bounds = array<i64: 32, 128>}, {pipeline_mode = #tpu.pipeline_mode<synchronous>, transform_indices = @transform_2, window_bounds = array<i64: 1, 128>}, {pipeline_mode = #tpu.pipeline_mode<synchronous>, transform_indices = @transform_3, window_bounds = array<i64: 128, 32>}, {pipeline_mode = #tpu.pipeline_mode<synchronous>, transform_indices = @transform_4, window_bounds = array<i64: 1, 32>}, {transform_indices = @transform_5, window_bounds = array<i64: 16, 32>}]} {
    %c0 = arith.constant 0 : index
    %c0_0 = arith.constant 0 : index
    %0 = vector.load %arg1[%c0, %c0_0] : memref<16x32xf32, #tpu.memory_space<vmem>>, vector<16x32xf32>
    %c0_1 = arith.constant 0 : index
    %c0_2 = arith.constant 0 : index
    %1 = vector.load %arg2[%c0_1, %c0_2] : memref<32x128xf32, #tpu.memory_space<vmem>>, vector<32x128xf32>
    %cst = arith.constant dense<0.000000e+00> : vector<16x128xf32>
    %2 = tpu.matmul %0, %1, %cst {dimension_numbers = #tpu.dot_dimension_numbers<[1], [0], [0], [1], [0, 0, 1, 1], [], []>} : vector<16x32xf32>, vector<32x128xf32>, vector<16x128xf32> -> vector<16x128xf32>
    %c0_3 = arith.constant 0 : index
    %c0_4 = arith.constant 0 : index
    %3 = vector.load %arg3[%c0_3, %c0_4] : memref<1x128xf32, #tpu.memory_space<vmem>>, vector<1x128xf32>
    %4 = vector.broadcast %3 : vector<1x128xf32> to vector<16x128xf32>
    %5 = arith.addf %2, %4 : vector<16x128xf32>
    %cst_5 = arith.constant 5.000000e-01 : f32
    %6 = vector.broadcast %cst_5 : f32 to vector<16x128xf32>
    %7 = arith.mulf %6, %5 : vector<16x128xf32>
    %cst_6 = arith.constant 0.707106769 : f32
    %8 = vector.broadcast %cst_6 : f32 to vector<16x128xf32>
    %9 = arith.mulf %5, %8 : vector<16x128xf32>
    %10 = math.erf %9 : vector<16x128xf32>
    %cst_7 = arith.constant 1.000000e+00 : f32
    %11 = vector.broadcast %cst_7 : f32 to vector<16x128xf32>
    %12 = arith.addf %11, %10 : vector<16x128xf32>
    %13 = arith.mulf %7, %12 : vector<16x128xf32>
    %c0_8 = arith.constant 0 : index
    %c0_9 = arith.constant 0 : index
    %14 = vector.load %arg4[%c0_8, %c0_9] : memref<128x32xf32, #tpu.memory_space<vmem>>, vector<128x32xf32>
    %cst_10 = arith.constant dense<0.000000e+00> : vector<16x32xf32>
    %15 = tpu.matmul %13, %14, %cst_10 {dimension_numbers = #tpu.dot_dimension_numbers<[1], [0], [0], [1], [0, 0, 1, 1], [], []>} : vector<16x128xf32>, vector<128x32xf32>, vector<16x32xf32> -> vector<16x32xf32>
    %c0_11 = arith.constant 0 : index
    %c0_12 = arith.constant 0 : index
    %16 = vector.load %arg5[%c0_11, %c0_12] : memref<1x32xf32, #tpu.memory_space<vmem>>, vector<1x32xf32>
    %17 = vector.broadcast %16 : vector<1x32xf32> to vector<16x32xf32>
    %18 = arith.addf %15, %17 : vector<16x32xf32>
    %c0_13 = arith.constant 0 : index
    %c0_14 = arith.constant 0 : index
    %19 = vector.load %arg6[%c0_13, %c0_14] : memref<16x32xf32, #tpu.memory_space<vmem>>, vector<16x32xf32>
    tpu.vector_store %arg6[%c0_13, %c0_14], %18 {strides = array<i32>} : memref<16x32xf32, #tpu.memory_space<vmem>>, vector<16x32xf32>,
    return
  }
  func.func @transform_0(%arg0: i32) -> (i32, i32) {
    %c0_i32 = arith.constant 0 : i32
    %c0_i32_0 = arith.constant 0 : i32
    return %arg0, %c0_i32 : i32, i32
  }
  func.func @transform_1(%arg0: i32) -> (i32, i32) {
    %c0_i32 = arith.constant 0 : i32
    %c0_i32_0 = arith.constant 0 : i32
    %c0_i32_1 = arith.constant 0 : i32
    return %c0_i32, %c0_i32_0 : i32, i32
  }
  func.func @transform_2(%arg0: i32) -> (i32, i32) {
    %c0_i32 = arith.constant 0 : i32
    %c0_i32_0 = arith.constant 0 : i32
    %c0_i32_1 = arith.constant 0 : i32
    return %c0_i32, %c0_i32_0 : i32, i32
  }
  func.func @transform_3(%arg0: i32) -> (i32, i32) {
    %c0_i32 = arith.constant 0 : i32
    %c0_i32_0 = arith.constant 0 : i32
    %c0_i32_1 = arith.constant 0 : i32
    return %c0_i32, %c0_i32_0 : i32, i32
  }
  func.func @transform_4(%arg0: i32) -> (i32, i32) {
    %c0_i32 = arith.constant 0 : i32
    %c0_i32_0 = arith.constant 0 : i32
    %c0_i32_1 = arith.constant 0 : i32
    return %c0_i32, %c0_i32_0 : i32, i32
  }
  func.func @transform_5(%arg0: i32) -> (i32, i32) {
    %c0_i32 = arith.constant 0 : i32
    %c0_i32_0 = arith.constant 0 : i32
    return %arg0, %c0_i32 : i32, i32
  }
}

</mosaic_0001>

<bundles_post_ra>
// kernel: feed_forward_block.1
= control target key start
LH: loop header
LB: loop body
LE: loop exit
PB: predicated region body
PF: predicated region fallthrough
CT: control target
= control target key end

     0   :  { %vm34_vm0 = vcmask 261120   ;;  %s508_s0 = inlined_call_operand.vmem [shape: f32[16,32], index: 0, kind: input, shape index: {}]   ;;  %s509_s1 = inlined_call_operand.vmem [shape: f32[32,128], index: 1, kind: input, shape index: {}]   ;;  %s510_s2 = inlined_call_operand.vmem [shape: f32[1,128], index: 2, kind: input, shape index: {}]   ;;  %s511_s3 = inlined_call_operand.vmem [shape: f32[128,32], index: 3, kind: input, shape index: {}]   ;;  %s512_s4 = inlined_call_operand.vmem [shape: f32[1,32], index: 4, kind: input, shape index: {}]   ;;  %s513_s5 = inlined_call_operand.hbm [shape: f32[16,32], index: 5, kind: output, shape index: {}]  }
   0x1   :  { %v23_v0 = vld [vmem:[%s509_s1] sm:$0xff]  ;;  %v24_v1 = vld [vmem:[%s509_s1 + $0x8] sm:$0xff]  ;;  %v25_v2 = vld [vmem:[%s509_s1 + $0x10] sm:$0xff] }
   0x2   :  { %v316_v3 = vpack.c.bf16 %v24_v1, %v23_v0  ;;  %v26_v4 = vld [vmem:[%s509_s1 + $0x18] sm:$0xff]  ;;  %v21_v5 = vld [vmem:[%s508_s0] sm:$0xff]  ;;  %v127_v8 = vld [vmem:[%s511_s3 + $0x8] sm:$0xff] }
   0x3   :  { %v320_v6 = vpack.c.bf16 %v26_v4, %v25_v2  ;;  %278 = vmatprep.mubr.msk.f32.mxu0 %vm34_vm0, %v21_v5  ;;  %v126_v7 = vld [vmem:[%s511_s3] sm:$0xff]  ;;  %v128_v9 = vld [vmem:[%s511_s3 + $0x10] sm:$0xff]  ;;  %v129_v11 = vld [vmem:[%s511_s3 + $0x18] sm:$0xff] }
   0x4   :  { %317 = vmatprep.subr.bf16.mxu0 %v316_v3  ;;  %v324_v10 = vpack.c.bf16 %v127_v8, %v126_v7  ;;  %v328_v12 = vpack.c.bf16 %v129_v11, %v128_v9  ;;  %v130_v13 = vld [vmem:[%s511_s3 + $0x20] sm:$0xff]  ;;  %v131_v14 = vld [vmem:[%s511_s3 + $0x28] sm:$0xff] }
   0x5   :  { %319 = vmatpush3.bf16.msra.mxu0 %v316_v3 }
   0x6   :  { %10 = vsyncpa [#allocation3], 0  ;;  %321 = vmatprep.subr.bf16.mxu0 %v320_v6  ;;  %325 = vmatprep.subr.bf16.mxu1 %v324_v10  ;;  %v332_v15 = vpack.c.bf16 %v131_v14, %v130_v13  ;;  %v22_v16 = vld [vmem:[%s508_s0 + $0x8] sm:$0xff]  ;;  %v132_v17 = vld [vmem:[%s511_s3 + $0x30] sm:$0xff]  ;;  %s387_s11 = smov [#allocation2]  }
   0x7   :  { %327 = vmatpush3.bf16.msra.mxu1 %v324_v10  ;;  %v133_v18 = vld [vmem:[%s511_s3 + $0x38] sm:$0xff]  ;;  %v134_v20 = vld [vmem:[%s511_s3 + $0x40] sm:$0xff]  ;;  %v135_v21 = vld [vmem:[%s511_s3 + $0x48] sm:$0xff]  ;;  %s231_s12 = sshll.u32 %s387_s11, 4  ;;  %s232_s12 = int_to_ptr.vmem [resolvable:$true] %s231_s12 }
   0x8   :  { %329 = vmatprep.subr.bf16.mxu1 %v328_v12  ;;  %v336_v19 = vpack.c.bf16 %v133_v18, %v132_v17  ;;  %v340_v22 = vpack.c.bf16 %v135_v21, %v134_v20  ;;  %v136_v23 = vld [vmem:[%s511_s3 + $0x50] sm:$0xff]  ;;  %v137_v24 = vld [vmem:[%s511_s3 + $0x58] sm:$0xff]  ;;  %v138_v26 = vld [vmem:[%s511_s3 + $0x60] sm:$0xff]  ;;  %s363_s13 = scalar_lea.vmem %s232_s12, 256  ;;  %p368_p1 = scmp.lt.s32.totalorder %s232_s12, %s232_s12 }
   0x9   :  { %323 = vmatpush3.bf16.msra.mxu0 %v320_v6  ;;  %v344_v25 = vpack.c.bf16 %v137_v24, %v136_v23  ;;  %v139_v27 = vld [vmem:[%s511_s3 + $0x68] sm:$0xff]  ;;  %v140_v29 = vld [vmem:[%s511_s3 + $0x70] sm:$0xff]  ;;  %v141_v30 = vld [vmem:[%s511_s3 + $0x78] sm:$0xff]  ;;  %p364_p0 = scmp.ne.s32.totalorder %s232_s12, %s363_s13  ;;  %p369_p2 = scmp.lt.s32.totalorder %s363_s13, %s363_s13 }
   0xa   :  { %v348_v28 = vpack.c.bf16 %v139_v27, %v138_v26  ;;  %v352_v31 = vpack.c.bf16 %v141_v30, %v140_v29  ;;  %v242_v32 = vld [vmem:[%s510_s2] ss:$0 sm:$0xff] }
   0xb   :  { %331 = vmatpush3.bf16.msra.mxu1 %v328_v12  ;;  %v245_v47 = vld [vmem:[%s512_s4] ss:$0 sm:$0xff]  ;;  %p370_p3 = por %p369_p2, %p368_p1 }
   0xc   :  { %279 = vmatmul.mubr.msk.f32.vlgmr.msra.gmra.mrb[0].mxu0 %vm34_vm0, %v22_v16  ;;  %333 = vmatprep.subr.bf16.mxu1 %v332_v15 }
   0xd   :  { %p371_p4 = pnand %p370_p3, %p364_p0 }
   0xf   :  { %335 = vmatpush3.bf16.msra.mxu1 %v332_v15 }
  0x10   :  { %337 = vmatprep.subr.bf16.mxu1 %v336_v19 }
  0x13   :  { %339 = vmatpush3.bf16.msra.mxu1 %v336_v19 }
  0x14   :  { %341 = vmatprep.subr.bf16.mxu1 %v340_v22 }
  0x17   :  { %343 = vmatpush3.bf16.msra.mxu1 %v340_v22 }
  0x18   :  { %345 = vmatprep.subr.bf16.mxu1 %v344_v25 }
  0x1b   :  { %347 = vmatpush3.bf16.msra.mxu1 %v344_v25 }
  0x1c   :  { %349 = vmatprep.subr.bf16.mxu1 %v348_v28 }
  0x1f   :  { %351 = vmatpush3.bf16.msra.mxu1 %v348_v28 }
  0x20   :  { %353 = vmatprep.subr.bf16.mxu1 %v352_v31 }
  0x23   :  { %355 = vmatpush3.bf16.msra.mxu1 %v352_v31 }
  0xdf   :  { %v280_v33 = vpop.f32.mrb[0].mxu0 }
  0xe0   :  { %v113_v34 = vadd.f32 %v280_v33, %v242_v32  ;;  %v107_v35 = vpop.f32.mrb[1].mxu0 }
  0xe1   :  { %v108_v36 = vadd.f32 %v242_v32, %v107_v35 }
  0xe2   :  { %v119_v37 = vmul.f32 0.70710677, %v113_v34  ;;  %v117_v44 = vmul.f32 0.5, %v113_v34 }
  0xe3   :  { %v118_v38 = vmul.f32 0.70710677, %v108_v36  ;;  %v116_v42 = vmul.f32 0.5, %v108_v36 }
  0xe4   :  { %359 = verf.f32 %v119_v37 }
  0xe5   :  { %361 = verf.f32 %v118_v38 }
  0xee   :  { %v360_v39 = vpop.eup %359 }
  0xef   :  { %v362_v40 = vpop.eup %361  ;;  %v123_v41 = vadd.f32 1.0, %v360_v39 }
  0xf0   :  { %v122_v43 = vadd.f32 1.0, %v362_v40 }
  0xf1   :  { %v125_v46 = vmul.f32 %v123_v41, %v117_v44 }
  0xf2   :  { %v124_v45 = vmul.f32 %v122_v43, %v116_v42 }
  0xf4   :  { %313 = vmatprep.mubr.f32.mxu1 %v124_v45 }
  0xf5   :  { %314 = vmatmul.mubr.f32.vlgmr.msra.gmra.mrb[0].mxu1 %v125_v46 }
 0x1c8   :  { %v315_v48 = vpop.f32.mrb[0].mxu1 }
 0x1c9   :  { %v221_v49 = vadd.f32 %v315_v48, %v245_v47  ;;  %v215_v50 = vpop.f32.mrb[1].mxu1 }
 0x1ca   :  { %v216_v51 = vadd.f32 %v245_v47, %v215_v50 }
 0x1cb   :  { %225 = vst.msk [vmem:[#allocation2 + $0x8] sm:$0xff] %vm34_vm0, %v221_v49 }
 0x1cc   :  { %224 = vst.msk [vmem:[#allocation2] sm:$0xff] %vm34_vm0, %v216_v51 }
 0x1cd   :  { %374 = shalt.err (!%p371_p4)
}
 0x1ce   :  { %s375_s15 = scalar_lea.hbm %s513_s5, 256 }
 0x1cf   :  { %p376_p5 = scmp.ne.s32.totalorder %s513_s5, %s375_s15  ;;  %p379_p6 = scmp.lt.u32.totalorder %s375_s15, %s513_s5 }
 0x1d1   :  { %p381_p7 = pnand %p379_p6, %p376_p5 }
 0x1d3   :  { %384 = shalt.err (!%p381_p7)
}
 0x1d4   :  { %s388_s20 = smov 128   ;;  %s389_s21 = smov 8  }
 0x1d5   :  { %237 = dma.vmem_to_hbm [thread:$0]  %s232_s12, 256, %s513_s5, [#allocation3], %s388_s20, %s388_s20, %s389_s21  }
 0x1d6   :  { %385 = dma.done.wait [#allocation3], 256  }
 0x1d7   :  { %386 = vsyncadd [#allocation3], 4294967040 }
 0x1d8   :  { %241 = vsyncpa [#allocation3], 1 }

</bundles_post_ra>
